<compile_context>
chip_gen: v5e
topology: v5e:2x2
jax: 0.10.0
libtpu: 0.0.40
codegen_flags: <defaults>
</compile_context>

<pallas_src>
import functools

import jax
import jax.numpy as jnp
from jax.experimental import pallas as pl
from jax.experimental.pallas import tpu as pltpu


def _fold_bn(gamma, beta, mean, var, eps=1e-5):
    """Fold eval-mode BatchNorm into per-channel scale / bias, shaped (C,)."""
    scale = gamma / jnp.sqrt(var + eps)
    bias = beta - mean * scale
    return scale, bias


def _border_masks(H, W):
    """(9, H*W) float32 validity masks for the 3x3 taps (zero padding)."""
    hi, wi = jnp.meshgrid(jnp.arange(H), jnp.arange(W), indexing="ij")
    masks = []
    for ky in range(3):
        for kx in range(3):
            dy, dx = ky - 1, kx - 1
            ok = ((hi + dy >= 0) & (hi + dy <= H - 1) &
                  (wi + dx >= 0) & (wi + dx <= W - 1))
            masks.append(ok.reshape(-1))
    return jnp.stack(masks).astype(jnp.float32)


def _block_kernel(x_ref, w1_ref, b1_ref, dw_ref, mask_ref, w3_ref, bo_ref,
                  *rest, H, W, has_shortcut_conv):
    if has_shortcut_conv:
        wsc_ref, o_ref = rest
    else:
        (o_ref,) = rest

    HW = H * W
    x = x_ref[0]                                              # (Cin, HW)

    # ---- conv1 (1x1, bn1 scale pre-folded) + bias + ReLU : MXU ----
    h = jnp.dot(w1_ref[...], x, preferred_element_type=jnp.float32)   # (Cm, HW)
    h = jnp.maximum(h + b1_ref[...], 0.0)

    # ---- depthwise 3x3, padding=1 (bn2 scale folded into taps) ----
    # 8 static lane rolls (XLU) * host-precomputed border masks; no VMEM scratch.
    dw = dw_ref[...]                                          # (Cm, 9), one load
    masks = mask_ref[...]                                     # (9, HW), one load
    acc = h * dw[:, 4:5]                                      # center tap
    for ky in range(3):
        for kx in range(3):
            if ky == 1 and kx == 1:
                continue
            k = ky * 3 + kx
            off = (ky - 1) * W + (kx - 1)
            # shifted[p] = h[p + off] (circular); wrap is killed by the mask.
            shifted = pltpu.roll(h, shift=(-off) % HW, axis=1)
            acc = acc + (shifted * masks[k:k + 1, :]) * dw[:, k:k + 1]

    # ---- conv3 (bn2 bias + bn3 folded into bo) + shortcut + ReLU ----
    y = jnp.dot(w3_ref[...], acc, preferred_element_type=jnp.float32) + bo_ref[...]
    if has_shortcut_conv:
        y = y + jnp.dot(wsc_ref[...], x, preferred_element_type=jnp.float32)
    else:
        y = y + x                      # identity shortcut (Cin == Cout, stride == 1)
    o_ref[0] = jnp.maximum(y, 0.0)


def fold_params(raw, *, has_shortcut_conv, eps=1e-5):
    """Fold BN scales into conv weights, bn2 bias through conv3, on the host."""
    s1, b1 = _fold_bn(**raw["bn1"], eps=eps)
    s2, b2 = _fold_bn(**raw["bn2"], eps=eps)
    s3, b3 = _fold_bn(**raw["bn3"], eps=eps)
    w1f = raw["w1"] * s1[:, None]                 # (Cm, Cin)
    dwf = raw["dw"] * s2[:, None]                 # (Cm, 9)
    w3f = raw["w3"] * s3[:, None]                 # (Cout, Cm)
    b_out = w3f @ b2 + b3                         # (Cout,)
    p = dict(w1=w1f.astype(jnp.float32),
             b1=b1.reshape(-1, 1).astype(jnp.float32),
             dw=dwf.astype(jnp.float32),
             w3=w3f.astype(jnp.float32))
    if has_shortcut_conv:
        ssc, bsc = _fold_bn(**raw["bnsc"], eps=eps)
        p["wsc"] = (raw["wsc"] * ssc[:, None]).astype(jnp.float32)
        b_out = b_out + bsc
    p["b_out"] = b_out.reshape(-1, 1).astype(jnp.float32)
    return p


def depthwise_with_skip_block(x_nchw, raw_params, *, stride=1):
    """Fused block. x_nchw: (B, Cin, H, W) float32 (PyTorch layout). Returns NCHW."""
    # TODO(synk): stride > 1 not implemented.
    assert stride == 1, "only stride=1 is implemented in this kernel"
    B, Cin, H, W = x_nchw.shape
    Cm = raw_params["w1"].shape[0]
    Cout = raw_params["w3"].shape[0]
    HW = H * W
    has_sc = (stride != 1) or (Cin != Cout)

    p = fold_params(raw_params, has_shortcut_conv=has_sc)
    x2 = x_nchw.reshape(B, Cin, HW)
    masks = _border_masks(H, W)                   # (9, HW)

    kernel = functools.partial(_block_kernel, H=H, W=W, has_shortcut_conv=has_sc)

    def full(shape):
        return pl.BlockSpec(shape, lambda b, _n=len(shape): (0,) * _n)

    in_specs = [
        pl.BlockSpec((1, Cin, HW), lambda b: (b, 0, 0)),
        full((Cm, Cin)), full((Cm, 1)),
        full((Cm, 9)), full((9, HW)),
        full((Cout, Cm)), full((Cout, 1)),
    ]
    args = [x2, p["w1"], p["b1"], p["dw"], masks, p["w3"], p["b_out"]]
    if has_sc:
        in_specs.append(full((Cout, Cin)))
        args.append(p["wsc"])

    flops = 2 * B * HW * (Cin * Cm + 9 * Cm + Cm * Cout
                          + (Cin * Cout if has_sc else 0))
    bytes_accessed = 4 * (int(x2.size) + B * Cout * HW
                          + sum(int(a.size) for a in args[1:]))

    out = pl.pallas_call(
        kernel,
        out_shape=jax.ShapeDtypeStruct((B, Cout, HW), jnp.float32),
        grid=(B,),
        in_specs=in_specs,
        out_specs=pl.BlockSpec((1, Cout, HW), lambda b: (b, 0, 0)),
        compiler_params=pltpu.CompilerParams(dimension_semantics=("parallel",)),
        cost_estimate=pl.CostEstimate(flops=flops, transcendentals=0,
                                      bytes_accessed=bytes_accessed),
    )(*args)
    return out.reshape(B, Cout, H, W)


def reference(x_nchw, raw, *, stride=1, eps=1e-5):
    """Pure-JAX NCHW reference with un-folded eval-mode BatchNorm."""
    B, Cin, H, W = x_nchw.shape
    w1, dw, w3, wsc = raw["w1"], raw["dw"], raw["w3"], raw["wsc"]
    Cm, Cout = w1.shape[0], w3.shape[0]

    def bn(t, prm):
        s = prm["gamma"] / jnp.sqrt(prm["var"] + eps)
        b = prm["beta"] - prm["mean"] * s
        return t * s.reshape(1, -1, 1, 1) + b.reshape(1, -1, 1, 1)

    h = jnp.maximum(bn(jnp.einsum("oi,bihw->bohw", w1, x_nchw), raw["bn1"]), 0.0)
    hp = jnp.pad(h, ((0, 0), (0, 0), (1, 1), (1, 1)))
    acc = jnp.zeros((B, Cm, H, W), jnp.float32)
    for ky in range(3):
        for kx in range(3):
            acc = acc + hp[:, :, ky:ky + H, kx:kx + W] * dw[:, ky * 3 + kx].reshape(1, Cm, 1, 1)
    g = bn(acc, raw["bn2"])
    y = bn(jnp.einsum("om,bmhw->bohw", w3, g), raw["bn3"])
    if stride != 1 or Cin != Cout:
        sc = bn(jnp.einsum("oi,bihw->bohw", wsc, x_nchw), raw["bnsc"])
    else:
        sc = x_nchw
    return jnp.maximum(y + sc, 0.0)


def make_raw_params(key, in_planes, out_planes, reduction=1):
    mid_planes = int((1.0 / float(reduction)) * out_planes)
    ks = jax.random.split(key, 20)

    def bn(kg, kb, km, kv, c):
        return dict(
            gamma=1.0 + 0.1 * jax.random.normal(kg, (c,), jnp.float32),
            beta=0.1 * jax.random.normal(kb, (c,), jnp.float32),
            mean=0.1 * jax.random.normal(km, (c,), jnp.float32),
            var=jnp.abs(jax.random.normal(kv, (c,), jnp.float32)) + 0.5,
        )

    return dict(
        # conv1: PyTorch (mid, in, 1, 1) -> (mid, in)
        w1=0.2 * jax.random.normal(ks[0], (mid_planes, in_planes), jnp.float32),
        # depthwise: PyTorch (mid, 1, 3, 3) -> (mid, 9), col = ky*3+kx
        dw=0.2 * jax.random.normal(ks[1], (mid_planes, 9), jnp.float32),
        # conv3: PyTorch (out, mid, 1, 1) -> (out, mid)
        w3=0.2 * jax.random.normal(ks[2], (out_planes, mid_planes), jnp.float32),
        # shortcut conv: PyTorch (out, in, 1, 1) -> (out, in)
        wsc=0.2 * jax.random.normal(ks[3], (out_planes, in_planes), jnp.float32),
        bn1=bn(ks[4], ks[5], ks[6], ks[7], mid_planes),
        bn2=bn(ks[8], ks[9], ks[10], ks[11], mid_planes),
        bn3=bn(ks[12], ks[13], ks[14], ks[15], out_planes),
        bnsc=bn(ks[16], ks[17], ks[18], ks[19], out_planes),
    )


if __name__ == "__main__":
    B, H, W = 2, 16, 16
    in_planes, out_planes, reduction, stride = 4, 8, 1, 1

    key = jax.random.PRNGKey(0)
    kx_, kp = jax.random.split(key)
    # PyTorch forward input: NCHW (B, Cin, H, W) = (2, 4, 16, 16).
    x_nchw = jax.random.normal(kx_, (B, in_planes, H, W), jnp.float32)
    raw = make_raw_params(kp, in_planes, out_planes, reduction)

    out = jax.block_until_ready(depthwise_with_skip_block(x_nchw, raw, stride=stride))
    ref = jax.block_until_ready(reference(x_nchw, raw, stride=stride))

    assert out.shape == (B, out_planes, H, W)
    assert jnp.allclose(out, ref, atol=1e-4, rtol=1e-4), (
        f"max abs diff {float(jnp.max(jnp.abs(out - ref)))}")

    print("KERNEL_OK")
</pallas_src>

<mosaic_0001>
module attributes {stable_mosaic.version = 11 : i64} {
  func.func @_block_kernel(%arg0: i32, %arg1: memref<1x4x256xf32, #tpu.memory_space<vmem>>, %arg2: memref<8x4xf32, #tpu.memory_space<vmem>>, %arg3: memref<8x1xf32, #tpu.memory_space<vmem>>, %arg4: memref<8x9xf32, #tpu.memory_space<vmem>>, %arg5: memref<9x256xf32, #tpu.memory_space<vmem>>, %arg6: memref<8x8xf32, #tpu.memory_space<vmem>>, %arg7: memref<8x1xf32, #tpu.memory_space<vmem>>, %arg8: memref<8x4xf32, #tpu.memory_space<vmem>>, %arg9: memref<1x8x256xf32, #tpu.memory_space<vmem>>) attributes {dimension_semantics = [#tpu.dimension_semantics<parallel>], iteration_bounds = array<i64: 2>, scalar_prefetch = 0 : i64, scratch_operands = 0 : i64, tpu.core_type = #tpu.core_type<tc>, window_params = [{transform_indices = @transform_0, window_bounds = array<i64: 1, 4, 256>}, {pipeline_mode = #tpu.pipeline_mode<synchronous>, transform_indices = @transform_1, window_bounds = array<i64: 8, 4>}, {pipeline_mode = #tpu.pipeline_mode<synchronous>, transform_indices = @transform_2, window_bounds = array<i64: 8, 1>}, {pipeline_mode = #tpu.pipeline_mode<synchronous>, transform_indices = @transform_3, window_bounds = array<i64: 8, 9>}, {pipeline_mode = #tpu.pipeline_mode<synchronous>, transform_indices = @transform_4, window_bounds = array<i64: 9, 256>}, {pipeline_mode = #tpu.pipeline_mode<synchronous>, transform_indices = @transform_5, window_bounds = array<i64: 8, 8>}, {pipeline_mode = #tpu.pipeline_mode<synchronous>, transform_indices = @transform_6, window_bounds = array<i64: 8, 1>}, {pipeline_mode = #tpu.pipeline_mode<synchronous>, transform_indices = @transform_7, window_bounds = array<i64: 8, 4>}, {transform_indices = @transform_8, window_bounds = array<i64: 1, 8, 256>}]} {
    %c0 = arith.constant 0 : index
    %c0_0 = arith.constant 0 : index
    %c0_1 = arith.constant 0 : index
    %0 = vector.load %arg1[%c0, %c0_0, %c0_1] : memref<1x4x256xf32, #tpu.memory_space<vmem>>, vector<1x4x256xf32>
    %1 = vector.shape_cast %0 : vector<1x4x256xf32> to vector<4x256xf32>
    %c0_2 = arith.constant 0 : index
    %c0_3 = arith.constant 0 : index
    %2 = vector.load %arg2[%c0_2, %c0_3] : memref<8x4xf32, #tpu.memory_space<vmem>>, vector<8x4xf32>
    %cst = arith.constant dense<0.000000e+00> : vector<8x256xf32>
    %3 = tpu.matmul %2, %1, %cst {dimension_numbers = #tpu.dot_dimension_numbers<[1], [0], [0], [1], [0, 0, 1, 1], [], []>} : vector<8x4xf32>, vector<4x256xf32>, vector<8x256xf32> -> vector<8x256xf32>
    %c0_4 = arith.constant 0 : index
    %c0_5 = arith.constant 0 : index
    %4 = vector.load %arg3[%c0_4, %c0_5] : memref<8x1xf32, #tpu.memory_space<vmem>>, vector<8x1xf32>
    %5 = vector.broadcast %4 : vector<8x1xf32> to vector<8x256xf32>
    %6 = arith.addf %3, %5 : vector<8x256xf32>
    %cst_6 = arith.constant 0.000000e+00 : f32
    %7 = vector.broadcast %cst_6 : f32 to vector<8x256xf32>
    %8 = arith.maximumf %6, %7 : vector<8x256xf32>
    %c0_7 = arith.constant 0 : index
    %c0_8 = arith.constant 0 : index
    %9 = vector.load %arg4[%c0_7, %c0_8] : memref<8x9xf32, #tpu.memory_space<vmem>>, vector<8x9xf32>
    %c0_9 = arith.constant 0 : index
    %c0_10 = arith.constant 0 : index
    %10 = vector.load %arg5[%c0_9, %c0_10] : memref<9x256xf32, #tpu.memory_space<vmem>>, vector<9x256xf32>
    %11 = vector.extract_strided_slice %9 {offsets = [0, 4], sizes = [8, 1], strides = [1, 1]} : vector<8x9xf32> to vector<8x1xf32>
    %12 = vector.broadcast %11 : vector<8x1xf32> to vector<8x256xf32>
    %13 = arith.mulf %8, %12 : vector<8x256xf32>
    %c17_i32 = arith.constant 17 : i32
    %14 = tpu.dynamic_rotate %8 by %c17_i32 dim 1 : vector<8x256xf32>, i32 -> vector<8x256xf32>
    %15 = vector.extract_strided_slice %10 {offsets = [0, 0], sizes = [1, 256], strides = [1, 1]} : vector<9x256xf32> to vector<1x256xf32>
    %16 = vector.broadcast %15 : vector<1x256xf32> to vector<8x256xf32>
    %17 = arith.mulf %14, %16 : vector<8x256xf32>
    %18 = vector.extract_strided_slice %9 {offsets = [0, 0], sizes = [8, 1], strides = [1, 1]} : vector<8x9xf32> to vector<8x1xf32>
    %19 = vector.broadcast %18 : vector<8x1xf32> to vector<8x256xf32>
    %20 = arith.mulf %17, %19 : vector<8x256xf32>
    %21 = arith.addf %13, %20 : vector<8x256xf32>
    %c16_i32 = arith.constant 16 : i32
    %22 = tpu.dynamic_rotate %8 by %c16_i32 dim 1 : vector<8x256xf32>, i32 -> vector<8x256xf32>
    %23 = vector.extract_strided_slice %10 {offsets = [1, 0], sizes = [1, 256], strides = [1, 1]} : vector<9x256xf32> to vector<1x256xf32>
    %24 = vector.broadcast %23 : vector<1x256xf32> to vector<8x256xf32>
    %25 = arith.mulf %22, %24 : vector<8x256xf32>
    %26 = vector.extract_strided_slice %9 {offsets = [0, 1], sizes = [8, 1], strides = [1, 1]} : vector<8x9xf32> to vector<8x1xf32>
    %27 = vector.broadcast %26 : vector<8x1xf32> to vector<8x256xf32>
    %28 = arith.mulf %25, %27 : vector<8x256xf32>
    %29 = arith.addf %21, %28 : vector<8x256xf32>
    %c15_i32 = arith.constant 15 : i32
    %30 = tpu.dynamic_rotate %8 by %c15_i32 dim 1 : vector<8x256xf32>, i32 -> vector<8x256xf32>
    %31 = vector.extract_strided_slice %10 {offsets = [2, 0], sizes = [1, 256], strides = [1, 1]} : vector<9x256xf32> to vector<1x256xf32>
    %32 = vector.broadcast %31 : vector<1x256xf32> to vector<8x256xf32>
    %33 = arith.mulf %30, %32 : vector<8x256xf32>
    %34 = vector.extract_strided_slice %9 {offsets = [0, 2], sizes = [8, 1], strides = [1, 1]} : vector<8x9xf32> to vector<8x1xf32>
    %35 = vector.broadcast %34 : vector<8x1xf32> to vector<8x256xf32>
    %36 = arith.mulf %33, %35 : vector<8x256xf32>
    %37 = arith.addf %29, %36 : vector<8x256xf32>
    %c1_i32 = arith.constant 1 : i32
    %38 = tpu.dynamic_rotate %8 by %c1_i32 dim 1 : vector<8x256xf32>, i32 -> vector<8x256xf32>
    %39 = vector.extract_strided_slice %10 {offsets = [3, 0], sizes = [1, 256], strides = [1, 1]} : vector<9x256xf32> to vector<1x256xf32>
    %40 = vector.broadcast %39 : vector<1x256xf32> to vector<8x256xf32>
    %41 = arith.mulf %38, %40 : vector<8x256xf32>
    %42 = vector.extract_strided_slice %9 {offsets = [0, 3], sizes = [8, 1], strides = [1, 1]} : vector<8x9xf32> to vector<8x1xf32>
    %43 = vector.broadcast %42 : vector<8x1xf32> to vector<8x256xf32>
    %44 = arith.mulf %41, %43 : vector<8x256xf32>
    %45 = arith.addf %37, %44 : vector<8x256xf32>
    %c255_i32 = arith.constant 255 : i32
    %46 = tpu.dynamic_rotate %8 by %c255_i32 dim 1 : vector<8x256xf32>, i32 -> vector<8x256xf32>
    %47 = vector.extract_strided_slice %10 {offsets = [5, 0], sizes = [1, 256], strides = [1, 1]} : vector<9x256xf32> to vector<1x256xf32>
    %48 = vector.broadcast %47 : vector<1x256xf32> to vector<8x256xf32>
    %49 = arith.mulf %46, %48 : vector<8x256xf32>
    %50 = vector.extract_strided_slice %9 {offsets = [0, 5], sizes = [8, 1], strides = [1, 1]} : vector<8x9xf32> to vector<8x1xf32>
    %51 = vector.broadcast %50 : vector<8x1xf32> to vector<8x256xf32>
    %52 = arith.mulf %49, %51 : vector<8x256xf32>
    %53 = arith.addf %45, %52 : vector<8x256xf32>
    %c241_i32 = arith.constant 241 : i32
    %54 = tpu.dynamic_rotate %8 by %c241_i32 dim 1 : vector<8x256xf32>, i32 -> vector<8x256xf32>
    %55 = vector.extract_strided_slice %10 {offsets = [6, 0], sizes = [1, 256], strides = [1, 1]} : vector<9x256xf32> to vector<1x256xf32>
    %56 = vector.broadcast %55 : vector<1x256xf32> to vector<8x256xf32>
    %57 = arith.mulf %54, %56 : vector<8x256xf32>
    %58 = vector.extract_strided_slice %9 {offsets = [0, 6], sizes = [8, 1], strides = [1, 1]} : vector<8x9xf32> to vector<8x1xf32>
    %59 = vector.broadcast %58 : vector<8x1xf32> to vector<8x256xf32>
    %60 = arith.mulf %57, %59 : vector<8x256xf32>
    %61 = arith.addf %53, %60 : vector<8x256xf32>
    %c240_i32 = arith.constant 240 : i32
    %62 = tpu.dynamic_rotate %8 by %c240_i32 dim 1 : vector<8x256xf32>, i32 -> vector<8x256xf32>
    %63 = vector.extract_strided_slice %10 {offsets = [7, 0], sizes = [1, 256], strides = [1, 1]} : vector<9x256xf32> to vector<1x256xf32>
    %64 = vector.broadcast %63 : vector<1x256xf32> to vector<8x256xf32>
    %65 = arith.mulf %62, %64 : vector<8x256xf32>
    %66 = vector.extract_strided_slice %9 {offsets = [0, 7], sizes = [8, 1], strides = [1, 1]} : vector<8x9xf32> to vector<8x1xf32>
    %67 = vector.broadcast %66 : vector<8x1xf32> to vector<8x256xf32>
    %68 = arith.mulf %65, %67 : vector<8x256xf32>
    %69 = arith.addf %61, %68 : vector<8x256xf32>
    %c239_i32 = arith.constant 239 : i32
    %70 = tpu.dynamic_rotate %8 by %c239_i32 dim 1 : vector<8x256xf32>, i32 -> vector<8x256xf32>
    %71 = vector.extract_strided_slice %10 {offsets = [8, 0], sizes = [1, 256], strides = [1, 1]} : vector<9x256xf32> to vector<1x256xf32>
    %72 = vector.broadcast %71 : vector<1x256xf32> to vector<8x256xf32>
    %73 = arith.mulf %70, %72 : vector<8x256xf32>
    %74 = vector.extract_strided_slice %9 {offsets = [0, 8], sizes = [8, 1], strides = [1, 1]} : vector<8x9xf32> to vector<8x1xf32>
    %75 = vector.broadcast %74 : vector<8x1xf32> to vector<8x256xf32>
    %76 = arith.mulf %73, %75 : vector<8x256xf32>
    %77 = arith.addf %69, %76 : vector<8x256xf32>
    %c0_11 = arith.constant 0 : index
    %c0_12 = arith.constant 0 : index
    %78 = vector.load %arg6[%c0_11, %c0_12] : memref<8x8xf32, #tpu.memory_space<vmem>>, vector<8x8xf32>
    %cst_13 = arith.constant dense<0.000000e+00> : vector<8x256xf32>
    %79 = tpu.matmul %78, %77, %cst_13 {dimension_numbers = #tpu.dot_dimension_numbers<[1], [0], [0], [1], [0, 0, 1, 1], [], []>} : vector<8x8xf32>, vector<8x256xf32>, vector<8x256xf32> -> vector<8x256xf32>
    %c0_14 = arith.constant 0 : index
    %c0_15 = arith.constant 0 : index
    %80 = vector.load %arg7[%c0_14, %c0_15] : memref<8x1xf32, #tpu.memory_space<vmem>>, vector<8x1xf32>
    %81 = vector.broadcast %80 : vector<8x1xf32> to vector<8x256xf32>
    %82 = arith.addf %79, %81 : vector<8x256xf32>
    %c0_16 = arith.constant 0 : index
    %c0_17 = arith.constant 0 : index
    %83 = vector.load %arg8[%c0_16, %c0_17] : memref<8x4xf32, #tpu.memory_space<vmem>>, vector<8x4xf32>
    %cst_18 = arith.constant dense<0.000000e+00> : vector<8x256xf32>
    %84 = tpu.matmul %83, %1, %cst_18 {dimension_numbers = #tpu.dot_dimension_numbers<[1], [0], [0], [1], [0, 0, 1, 1], [], []>} : vector<8x4xf32>, vector<4x256xf32>, vector<8x256xf32> -> vector<8x256xf32>
    %85 = arith.addf %82, %84 : vector<8x256xf32>
    %cst_19 = arith.constant 0.000000e+00 : f32
    %86 = vector.broadcast %cst_19 : f32 to vector<8x256xf32>
    %87 = arith.maximumf %85, %86 : vector<8x256xf32>
    %c0_20 = arith.constant 0 : index
    %c0_21 = arith.constant 0 : index
    %c0_22 = arith.constant 0 : index
    %88 = vector.load %arg9[%c0_20, %c0_21, %c0_22] : memref<1x8x256xf32, #tpu.memory_space<vmem>>, vector<1x8x256xf32>
    %89 = vector.shape_cast %88 : vector<1x8x256xf32> to vector<8x256xf32>
    %90 = vector.shape_cast %87 : vector<8x256xf32> to vector<1x8x256xf32>
    tpu.vector_store %arg9[%c0_20, %c0_21, %c0_22], %90 {strides = array<i32>} : memref<1x8x256xf32, #tpu.memory_space<vmem>>, vector<1x8x256xf32>,
    return
  }
  func.func @transform_0(%arg0: i32) -> (i32, i32, i32) {
    %c0_i32 = arith.constant 0 : i32
    %c0_i32_0 = arith.constant 0 : i32
    %c0_i32_1 = arith.constant 0 : i32
    return %arg0, %c0_i32, %c0_i32_0 : i32, i32, i32
  }
  func.func @transform_1(%arg0: i32) -> (i32, i32) {
    %c0_i32 = arith.constant 0 : i32
    %c0_i32_0 = arith.constant 0 : i32
    %c0_i32_1 = arith.constant 0 : i32
    return %c0_i32, %c0_i32_0 : i32, i32
  }
  func.func @transform_2(%arg0: i32) -> (i32, i32) {
    %c0_i32 = arith.constant 0 : i32
    %c0_i32_0 = arith.constant 0 : i32
    %c0_i32_1 = arith.constant 0 : i32
    return %c0_i32, %c0_i32_0 : i32, i32
  }
  func.func @transform_3(%arg0: i32) -> (i32, i32) {
    %c0_i32 = arith.constant 0 : i32
    %c0_i32_0 = arith.constant 0 : i32
    %c0_i32_1 = arith.constant 0 : i32
    return %c0_i32, %c0_i32_0 : i32, i32
  }
  func.func @transform_4(%arg0: i32) -> (i32, i32) {
    %c0_i32 = arith.constant 0 : i32
    %c0_i32_0 = arith.constant 0 : i32
    %c0_i32_1 = arith.constant 0 : i32
    return %c0_i32, %c0_i32_0 : i32, i32
  }
  func.func @transform_5(%arg0: i32) -> (i32, i32) {
    %c0_i32 = arith.constant 0 : i32
    %c0_i32_0 = arith.constant 0 : i32
    %c0_i32_1 = arith.constant 0 : i32
    return %c0_i32, %c0_i32_0 : i32, i32
  }
  func.func @transform_6(%arg0: i32) -> (i32, i32) {
    %c0_i32 = arith.constant 0 : i32
    %c0_i32_0 = arith.constant 0 : i32
    %c0_i32_1 = arith.constant 0 : i32
    return %c0_i32, %c0_i32_0 : i32, i32
  }
  func.func @transform_7(%arg0: i32) -> (i32, i32) {
    %c0_i32 = arith.constant 0 : i32
    %c0_i32_0 = arith.constant 0 : i32
    %c0_i32_1 = arith.constant 0 : i32
    return %c0_i32, %c0_i32_0 : i32, i32
  }
  func.func @transform_8(%arg0: i32) -> (i32, i32, i32) {
    %c0_i32 = arith.constant 0 : i32
    %c0_i32_0 = arith.constant 0 : i32
    %c0_i32_1 = arith.constant 0 : i32
    return %arg0, %c0_i32, %c0_i32_0 : i32, i32, i32
  }
}

</mosaic_0001>

<bundles_post_ra>
// kernel: tpu_custom_call.1
= control target key start
LH: loop header
LB: loop body
LE: loop exit
PB: predicated region body
PF: predicated region fallthrough
CT: control target
= control target key end

     0   :  { %s1337_s0 = inlined_call_operand.hbm [shape: f32[2,4,256], index: 0, kind: input, shape index: {}]   ;;  %s1338_s1 = inlined_call_operand.vmem [shape: f32[8,4], index: 1, kind: input, shape index: {}]   ;;  %s1339_s2 = inlined_call_operand.vmem [shape: f32[8,1], index: 2, kind: input, shape index: {}]   ;;  %s1340_s3 = inlined_call_operand.vmem [shape: f32[8,9], index: 3, kind: input, shape index: {}]   ;;  %s1341_s4 = inlined_call_operand.vmem [shape: f32[9,256], index: 4, kind: input, shape index: {}]   ;;  %s1342_s5 = inlined_call_operand.hbm [shape: f32[8,8], index: 5, kind: input, shape index: {}]   ;;  %s1343_s6 = inlined_call_operand.vmem [shape: f32[8,1], index: 6, kind: input, shape index: {}]   ;;  %s1344_s7 = inlined_call_operand.vmem [shape: f32[8,4], index: 7, kind: input, shape index: {}]   ;;  %s1345_s8 = inlined_call_operand.hbm [shape: f32[2,8,256], index: 8, kind: output, shape index: {}]  }
   0x1   :  { %1346 = sst [smem:[#allocation12_spill]] %s1342_s5 }
   0x2   :  { %13 = vsyncpa [#allocation3], 0 }
   0x3   :  { %15 = vsyncpa [#allocation3 + $0x1], 0 }
   0x4   :  { %16 = vsyncpa [#allocation6], 0 }
   0x5   :  { %17 = vsyncpa [#allocation4], 0 }
   0x6   :  { %19 = vsyncpa [#allocation4 + $0x1], 0  ;;  %s1082_s27 = smov 0   ;;  %s1084_s28 = smov 0  }
   0x7   :  { %s1086_s29 = smov 0   ;;  %s1088_s30 = smov 0  }
   0x8 LB: > { %s1103_s9 = sadd.s32 4294967295, %s1017_s30   ;;  %s773_s10 = sadd.s32 4294967294, %s1017_s30   ;;  %s1017_s30 = sphi %s1088_s30, %s1359_s30   ;;  %s1013_s29 = sphi %s1086_s29, %s1358_s29   ;;  %s1009_s28 = sphi %s1084_s28, %s1357_s28   ;;  %s1005_s27 = sphi %s1082_s27, %s1356_s27  }
   0x9   : > { %p45_p0 = scmp.ne.s32.totalorder %s1009_s28, %s1005_s27  ;;  %p46_p1 = scmp.eq.s32.totalorder %s1103_s9, 0 }
   0xa   : > { %p216_p2 = scmp.eq.s32.totalorder %s1103_s9, 1  ;;  %p222_p3 = scmp.eq.s32.totalorder %s773_s10, 1 }
   0xb   : > { %p1112_p4 = por %p46_p1, %p45_p0  ;;  %p774_p5 = scmp.ge.s32.totalorder %s1017_s30, 1 }
   0xc   : > { %p1117_p6 = por %p222_p3, %p45_p0  ;;  %p229_p7 = scmp.lt.s32.totalorder %s1017_s30, 3 }
   0xd   : > { %s1349_s5 = sld [smem:[#allocation12_spill]]  ;;  %s1019_s17 = smov [#allocation5]  }
   0xe   : > { %p1125_p8 = pnand %p774_p5, %p229_p7  ;;  %s255_s18 = sshll.u32 %s1019_s17, 4  ;;  %s256_s18 = int_to_ptr.vmem [resolvable:$true] %s255_s18 }
   0xf   : > { %s1135_s19 = sadd.s32 1, %s1017_s30   ;;  %s32_s20 = sadd.s32 1, %s1013_s29 }
  0x10   : > { %p809_p10 = pneg %p1125_p8  ;;  %s29_s21 = ssub.s32 %s1017_s30, %s1135_s19 }
  0x11   : > { %p30_p12 = scmp.eq.s32.totalorder %s29_s21, 0  ;;  %p39_p13 = scmp.ne.s32.totalorder %s1013_s29, %s1009_s28 }
  0x12   : > { %p810_p11 = pnand %p809_p10, %p46_p1  ;;  %p40_p0 = scmp.eq.s32.totalorder %s1017_s30, 0 }
  0x13   : > { %s253_s15 = sshll.u32 %s1349_s5, 4  ;;  %p1148_p3 = por %p216_p2, %p39_p13  ;;  %s254_s15 = int_to_ptr.hbm [resolvable:$true] %s253_s15 }
  0x14   : > { %812 = dma.hbm_to_vmem [thread:$0]  (!%p810_p11), %s254_s15, 128, %s256_s18, [#allocation6]  }
  0x15   : > { %s1144_s22 = scalar_select %p30_p12, %s1013_s29, %s32_s20  }
  0x16   : > { %p822_p5 = scmp.lt.s32.totalorder %s1017_s30, 2  ;;  %s272_s24 = sand.u32 1, %s1013_s29  }
  0x17   : > { %1351 = sst [smem:[#allocation11_spill]] %s1144_s22  ;;  %s799_s25 = sshll.u32 %s1017_s30, 3 }
  0x18   : > { %p41_p7 = por %p40_p0, %p39_p13  ;;  %s777_s26 = sshll.u32 %s272_s24, 3 }
  0x19   : > { %s281_s14 = scalar_lea.hbm %s1337_s0, %s799_s25  ;;  %s276_s17 = scalar_lea.vmem [#allocation2], %s777_s26 }
  0x1a   : > { %s283_s15 = sshll.u32 %s281_s14, 4  ;;  %s285_s18 = sshll.u32 %s276_s17, 4  ;;  %s284_s15 = int_to_ptr.hbm [resolvable:$true] %s283_s15  ;;  %s286_s18 = int_to_ptr.vmem [resolvable:$true] %s285_s18 }
  0x1b   : > { %p1158_p10 = pnand %p822_p5, %p41_p7  ;;  %s273_s21 = scalar_lea.sflag [#allocation3], %s272_s24 }
  0x1c   : > { %s917_s5 = sshra.s32 %s284_s15, 4  ;;  %s924_s26 = scalar_lea.hbm %s1337_s0, 16  ;;  %s918_s5 = int_to_ptr.hbm [resolvable:$true] %s917_s5 }
  0x1d   : > { %s919_s22 = scalar_lea.hbm %s918_s5, 8  ;;  %p921_p11 = pneg %p1158_p10 }
  0x1e   : > { %p920_p2 = scmp.ne.s32.totalorder %s918_s5, %s919_s22  ;;  %p925_p0 = scmp.lt.s32.totalorder %s918_s5, %s1337_s0 }
  0x1f   : > { %p926_p5 = scmp.lt.s32.totalorder %s924_s26, %s919_s22 }
  0x20   : > { %p922_p12 = pnand %p921_p11, %p920_p2 }
  0x21   : > { %p927_p7 = por %p926_p5, %p925_p0 }
  0x22   : > { %p923_p13 = pneg %p922_p12 }
  0x24   : > { %p928_p9 = pnand %p927_p7, %p923_p13 }
  0x26   : > { %931 = shalt.err (!%p928_p9)
}
  0x27   : > { %816 = dma.hbm_to_vmem [thread:$0]  (!%p1158_p10), %s284_s15, 128, %s286_s18, %s273_s21  }
  0x28   : > { %294 = sbr.rel (%p1125_p8) target bundleno = 493 (0x1ed), region = 52  ;;  %s1175_s24 = sand.u32 (!%p1125_p8), 1, %s1009_s28  }
  0x29   : > { %s781_s17 = sshll.u32 (!%p1125_p8), %s1175_s24, 3  ;;  %s297_s25 = scalar_lea.sflag (!%p1125_p8), [#allocation3], %s1175_s24 }
  0x2a   : > { %s300_s10 = scalar_lea.vmem (!%p1125_p8), [#allocation2], %s781_s17 }
  0x2d   : > { %992 = dma.done.wait (%p1112_p4), %s297_s25, 128  }
  0x2e   : > { %994 = vsyncadd (%p1112_p4), %s297_s25, 4294967168 }
  0x2f   : > { %996 = dma.done.wait (%p46_p1), [#allocation6], 128  }
  0x30   : > { %998 = vsyncadd (%p46_p1), [#allocation6], 4294967168  ;;  %v1020_v0 = vmov 0   ;;  %v1021_v1 = vmov 4   ;;  %v1022_v2 = vmov 2   ;;  %v339_v3 = vld [vmem:[%s300_s10] sm:$0xff]  ;;  %v418_v35 = vlaneseq }
  0x31   : > { %875 = vset.pattern.permute.xlu0 %v1020_v0  ;;  %876 = vset.pattern.permute.xlu2 %v1021_v1  ;;  %v341_v4 = vld [vmem:[%s1339_s2] sm:$0xff]  ;;  %348 = vst [vmem:[#allocation1] ss:$2 sm:$0xff] %v339_v3  ;;  %vm355_vm0 = vcmask 1043456   ;;  %vm351_vm1 = vcmask 31744   ;;  %v1023_v9 = vmov 3  }
  0x32   : > { %879 = vset.pattern.permute.xlu1 %v1022_v2  ;;  %344 = vperm.xlu0 %875, %v341_v4   ;;  %v1193_v5 = vld [vmem:[%s1340_s3] sm:$0xff]  ;;  %v1024_v10 = vmov 1   ;;  %v1025_v11 = vmov 5   ;;  %v1026_v13 = vmov 6   ;;  %s1027_s20 = smov 16   ;;  %s1028_s21 = smov 17  }
  0x33   : > { %409 = vperm.xlu2 %876, %v1193_v5   ;;  %466 = vperm.xlu1 %879, %v1193_v5   ;;  %v340_v6 = vld [vmem:[%s1338_s1] sm:$0xff]  ;;  %s1029_s26 = smov 15   ;;  %s1030_s13 = smov 127   ;;  %v1033_v20 = vmov 8   ;;  %v1036_v22 = vmov 7   ;;  %v1242_v38 = vand.u32 127, %v418_v35 }
  0x34   : > { %s1031_s14 = smov 1   ;;  %s1032_s17 = smov 113   ;;  %v569_v21 = vld [vmem:[%s1343_s6] sm:$0xff]  ;;  %v1252_v40 = vld [vmem:[%s1341_s4 + $0x8] sm:$0xff]  ;;  %vm575_vm10 = vcmask 64512  }
  0x35   : > { %s1034_s25 = smov 112   ;;  %s1035_s10 = smov 111   ;;  %v1247_v39 = vld [vmem:[%s1341_s4] sm:$0xff]  ;;  %vm420_vm2 = vcmp.lt.s32.totalorder %v1242_v38, 17  ;;  %v424_v43 = vperm.slane %v1252_v40, 0  ;;  %vm439_vm3 = vcmp.lt.s32.totalorder %v1242_v38, 16 }
  0x36   : > { %v423_v42 = vperm.slane %v1247_v39, 0  ;;  %v442_v50 = vperm.slane %v1247_v39, 1  ;;  %v443_v51 = vperm.slane %v1252_v40, 1  ;;  %vm458_vm4 = vcmp.lt.s32.totalorder %v1242_v38, 15  ;;  %v619_v52 = vld [vmem:[%s1344_s7] sm:$0xff] }
  0x37   : > { %v461_v57 = vperm.slane %v1247_v39, 2  ;;  %v462_v58 = vperm.slane %v1252_v40, 2  ;;  %vm477_vm5 = vcmp.lt.s32.totalorder %v1242_v38, 1  ;;  %v480_v63 = vperm.slane %v1247_v39, 3 }
  0x38   : > { %v349_v7 = vld.sshfl [vmem:[#allocation1] sm:$0xff pattern:$0x75316420]  ;;  %v350_v8 = vld.sshfl [vmem:[#allocation1 + $0x8] sm:$0xff pattern:$0x75316420] }
  0x39   : > { %784 = vmatpush.msk.msra.mxu0 %vm355_vm0, %v349_v7  ;;  %786 = vmatpush.msk.msra.mxu1 %vm355_vm0, %v350_v8  ;;  %620 = vst [vmem:[#allocation1] ss:$2 sm:$0xff] %v339_v3  ;;  %vm496_vm6 = vcmp.lt.s32.totalorder %v1242_v38, 127  ;;  %vm515_vm7 = vcmp.lt.s32.totalorder %v1242_v38, 113  ;;  %vm534_vm8 = vcmp.lt.s32.totalorder %v1242_v38, 112  ;;  %vm553_vm9 = vcmp.lt.s32.totalorder %v1242_v38, 111 }
  0x3a   : > { %785 = vmatmul.msk.f32.vlgmr.msra.gmra.mxu0 %vm351_vm1, %v340_v6  ;;  %787 = vmatmul.msk.f32.vlgmr.msra.gmra.mxu1 %vm351_vm1, %v340_v6 }
  0x3b   : > { %880 = vset.pattern.permute.xlu1 %v1023_v9  ;;  %877 = vset.pattern.permute.xlu0 %v1024_v10 }
  0x3c   : > { %485 = vperm.xlu1 %880, %v1193_v5   ;;  %447 = vperm.xlu0 %877, %v1193_v5  }
  0x3d   : > { %884 = vset.pattern.permute.xlu2 %v1033_v20 }
  0x40   : > { %v621_v48 = vld.sshfl [vmem:[#allocation1] sm:$0xff pattern:$0x75316420]  ;;  %v622_v49 = vld.sshfl [vmem:[#allocation1 + $0x8] sm:$0xff pattern:$0x75316420] }
  0x41   : > { %790 = vmatpush.msk.msrb.mxu0 %vm355_vm0, %v621_v48  ;;  %792 = vmatpush.msk.msrb.mxu1 %vm355_vm0, %v622_v49  ;;  %v538_v48 = vperm.slane %v1252_v40, 7 }
  0x42   : > { %791 = vmatmul.msk.f32.vlgmr.msrb.gmra.mxu0 %vm351_vm1, %v619_v52  ;;  %793 = vmatmul.msk.f32.vlgmr.msrb.gmra.mxu1 %vm351_vm1, %v619_v52 }
  0x44   : > { %881 = vset.pattern.permute.xlu1 %v1025_v11  ;;  %878 = vset.pattern.permute.xlu0 %v1020_v0  ;;  %v481_v0 = vperm.slane %v1252_v40, 3 }
  0x45   : > { %504 = vperm.xlu1 %881, %v1193_v5   ;;  %428 = vperm.xlu0 %878, %v1193_v5  }
  0x4d   : > { %882 = vset.pattern.permute.xlu1 %v1026_v13 }
  0x8d   : > { %v410_v23 = vpop.permute.xlu2 %409 }
  0xa4   : > { %v345_v12 = vpop.permute.xlu0 %344 }
  0xa5   : > { %v1234_v24 = vpop.permute.xlu1 %466 }
  0xae   : > { %v1236_v26 = vpop.permute.xlu1 %485  ;;  %v448_v27 = vpop.permute.xlu0 %447 }
  0xb7   : > { %v377_v14 = vpop.f32.mrf.mxu0  ;;  %v397_v15 = vpop.f32.mrf.mxu1 }
  0xb8   : > { %v378_v16 = vadd.f32 %v377_v14, %v345_v12  ;;  %v398_v17 = vadd.f32 %v397_v15, %v345_v12  ;;  %v1238_v29 = vpop.permute.xlu1 %504  ;;  %v429_v30 = vpop.permute.xlu0 %428 }
  0xba   : > { %v1208_v18 = vmax.f32 %v378_v16, 0.0  ;;  %v1210_v19 = vmax.f32 %v398_v17, 0.0  ;;  %v499_v16 = vperm.slane %v1247_v39, 5  ;;  %v500_v17 = vperm.slane %v1252_v40, 5 }
  0xbc   : > { %437 = vrot.lane.b32.xlu2 %v1210_v19, %s1027_s20  ;;  %416 = vrot.lane.b32.xlu1 %v1210_v19, %s1028_s21  ;;  %v412_v1 = vmul.f32 %v410_v23, %v1208_v18  ;;  %v413_v8 = vmul.f32 %v410_v23, %v1210_v19 }
  0xbd   : > { %414 = vrot.lane.b32.xlu0 %v1208_v18, %s1028_s21 }
  0xc4   : > { %456 = vrot.lane.b32.xlu2 %v1210_v19, %s1029_s26  ;;  %435 = vrot.lane.b32.xlu1 %v1208_v18, %s1027_s20 }
  0xc5   : > { %494 = vrot.lane.b32.xlu0 %v1210_v19, %s1030_s13 }
  0xcc   : > { %475 = vrot.lane.b32.xlu2 %v1210_v19, %s1031_s14  ;;  %454 = vrot.lane.b32.xlu1 %v1208_v18, %s1029_s26 }
  0xcd   : > { %513 = vrot.lane.b32.xlu0 %v1210_v19, %s1032_s17 }
  0xd4   : > { %492 = vrot.lane.b32.xlu2 %v1208_v18, %s1030_s13  ;;  %473 = vrot.lane.b32.xlu1 %v1208_v18, %s1031_s14  ;;  %s967_s14 = scalar_lea.hbm %s1345_s8, 32 }
  0xd5   : > { %532 = vrot.lane.b32.xlu0 %v1210_v19, %s1034_s25 }
  0xdc   : > { %511 = vrot.lane.b32.xlu2 %v1208_v18, %s1032_s17  ;;  %523 = vperm.xlu1 %882, %v1193_v5  }
  0xdd   : > { %551 = vrot.lane.b32.xlu0 %v1210_v19, %s1035_s10 }
  0xe4   : > { %530 = vrot.lane.b32.xlu2 %v1208_v18, %s1034_s25  ;;  %883 = vset.pattern.permute.xlu1 %v1036_v22  ;;  %s783_s25 = sshll.u32 %s1175_s24, 4 }
  0xe5   : > { %572 = vperm.xlu0 %878, %v569_v21   ;;  %542 = vperm.xlu1 %883, %v1193_v5   ;;  %s338_s22 = scalar_lea.vmem [#allocation7], %s783_s25 }
  0xe6   : > { %s690_s15 = sshll.u32 %s338_s22, 4  ;;  %s691_s15 = int_to_ptr.vmem [resolvable:$true] %s690_s15 }
  0xec   : > { %549 = vrot.lane.b32.xlu2 %v1208_v18, %s1035_s10  ;;  %s800_s10 = sshll.u32 %s1103_s9, 4  ;;  %s677_s9 = scalar_lea.sflag [#allocation4], %s1175_s24 }
  0xed   : > { %s688_s11 = scalar_lea.hbm %s1345_s8, %s800_s10 }
  0xee   : > { %s692_s18 = sshll.u32 %s688_s11, 4  ;;  %s693_s18 = int_to_ptr.hbm [resolvable:$true] %s692_s18 }
  0xef   : > { %s961_s20 = sshra.s32 %s693_s18, 4  ;;  %s962_s20 = int_to_ptr.hbm [resolvable:$true] %s961_s20 }
  0xf0   : > { %s963_s21 = scalar_lea.hbm %s962_s20, 16  ;;  %p968_p9 = scmp.lt.s32.totalorder %s962_s20, %s1345_s8 }
  0xf1   : > { %p964_p1 = scmp.ne.s32.totalorder %s962_s20, %s963_s21  ;;  %p969_p10 = scmp.lt.s32.totalorder %s967_s14, %s963_s21 }
  0xf3   : > { %p965_p4 = pnand %p964_p1, %p1148_p3  ;;  %p970_p2 = por %p969_p10, %p968_p9 }
  0xf4   : > { %561 = vperm.xlu2 %884, %v1193_v5  }
  0xf5   : > { %p966_p8 = pneg %p965_p4 }
  0xf7   : > { %p971_p11 = pnand %p970_p2, %p966_p8 }
 0x116   : > { %v438_v25 = vpop.permute.xlu2 %437 }
 0x11e   : > { %v457_v28 = vpop.permute.xlu2 %456 }
 0x126   : > { %v476_v31 = vpop.permute.xlu2 %475 }
 0x12e   : > { %v417_v32 = vpop.permute.xlu1 %416  ;;  %v1240_v34 = vpop.permute.xlu2 %492 }
 0x12f   : > { %v415_v33 = vpop.permute.xlu0 %414 }
 0x130   : > { %v421_v45 = vsel %vm420_vm2, %v415_v33, %v417_v32  ;;  %v422_v46 = vsel %vm420_vm2, %v417_v32, %v415_v33  ;;  %v519_v32 = vperm.slane %v1252_v40, 6 }
 0x131   : > { %v425_v55 = vmul.f32 %v423_v42, %v422_v46  ;;  %v426_v56 = vmul.f32 %v424_v43, %v421_v45  ;;  %v537_v46 = vperm.slane %v1247_v39, 7 }
 0x133   : > { %v431_v3 = vmul.f32 %v429_v30, %v425_v55  ;;  %v432_v4 = vmul.f32 %v429_v30, %v426_v56 }
 0x135   : > { %v433_v18 = vadd.f32 %v431_v3, %v412_v1  ;;  %v434_v20 = vadd.f32 %v432_v4, %v413_v8 }
 0x136   : > { %v436_v36 = vpop.permute.xlu1 %435  ;;  %v1254_v41 = vpop.permute.xlu2 %511 }
 0x137   : > { %v495_v37 = vpop.permute.xlu0 %494  ;;  %v440_v53 = vsel %vm439_vm3, %v436_v36, %v438_v25  ;;  %v441_v54 = vsel %vm439_vm3, %v438_v25, %v436_v36 }
 0x138   : > { %v444_v61 = vmul.f32 %v442_v50, %v441_v54  ;;  %v445_v62 = vmul.f32 %v443_v51, %v440_v53  ;;  %v497_v19 = vsel %vm496_vm6, %v1240_v34, %v495_v37  ;;  %v498_v23 = vsel %vm496_vm6, %v495_v37, %v1240_v34 }
 0x139   : > { %v501_v33 = vmul.f32 %v499_v16, %v497_v19  ;;  %v502_v35 = vmul.f32 %v500_v17, %v498_v23 }
 0x13a   : > { %v450_v12 = vmul.f32 %v448_v27, %v444_v61  ;;  %v451_v13 = vmul.f32 %v448_v27, %v445_v62 }
 0x13b   : > { %v507_v49 = vmul.f32 %v1238_v29, %v501_v33  ;;  %v508_v50 = vmul.f32 %v1238_v29, %v502_v35 }
 0x13c   : > { %v452_v25 = vadd.f32 %v450_v12, %v433_v18  ;;  %v453_v27 = vadd.f32 %v451_v13, %v434_v20  ;;  %v667_v12 = vpop.f32.mrf.mxu1 }
 0x13e   : > { %v455_v44 = vpop.permute.xlu1 %454  ;;  %v531_v2 = vpop.permute.xlu2 %530 }
 0x13f   : > { %v514_v47 = vpop.permute.xlu0 %513  ;;  %v459_v59 = vsel %vm458_vm4, %v455_v44, %v457_v28  ;;  %v460_v60 = vsel %vm458_vm4, %v457_v28, %v455_v44 }
 0x140   : > { %v463_v5 = vmul.f32 %v461_v57, %v460_v60  ;;  %v464_v6 = vmul.f32 %v462_v58, %v459_v59  ;;  %v516_v43 = vsel %vm515_vm7, %v1254_v41, %v514_v47  ;;  %v517_v34 = vsel %vm515_vm7, %v514_v47, %v1254_v41  ;;  %v885_v41 = vld [vmem:[%s1341_s4 + $0x10] ss:$0 sm:$0xff]  ;;  %v886_v47 = vld [vmem:[%s1341_s4 + $0x18] ss:$0 sm:$0xff] }
 0x141   : > { %v521_v52 = vmul.f32 %v519_v32, %v517_v34 }
 0x142   : > { %v469_v21 = vmul.f32 %v1234_v24, %v463_v5  ;;  %v470_v22 = vmul.f32 %v1234_v24, %v464_v6 }
 0x144   : > { %v471_v36 = vadd.f32 %v469_v21, %v452_v25  ;;  %v472_v24 = vadd.f32 %v470_v22, %v453_v27 }
 0x146   : > { %v474_v7 = vpop.permute.xlu1 %473  ;;  %v550_v37 = vpop.permute.xlu2 %549 }
 0x147   : > { %v478_v9 = vsel %vm477_vm5, %v474_v7, %v476_v31  ;;  %v479_v10 = vsel %vm477_vm5, %v476_v31, %v474_v7  ;;  %v533_v11 = vpop.permute.xlu0 %532  ;;  %v518_v31 = vperm.slane %v1247_v39, 6 }
 0x148   : > { %v482_v14 = vmul.f32 %v480_v63, %v479_v10  ;;  %v483_v15 = vmul.f32 %v481_v0, %v478_v9  ;;  %v535_v38 = vsel %vm534_vm8, %v531_v2, %v533_v11  ;;  %v536_v53 = vsel %vm534_vm8, %v533_v11, %v531_v2  ;;  %v568_v9 = vld [vmem:[#allocation5] sm:$0xff]  ;;  %v647_v11 = vpop.f32.mrf.mxu0 }
 0x149   : > { %v520_v51 = vmul.f32 %v518_v31, %v516_v43  ;;  %v539_v59 = vmul.f32 %v537_v46, %v535_v38  ;;  %v540_v60 = vmul.f32 %v538_v48, %v536_v53 }
 0x14a   : > { %v488_v28 = vmul.f32 %v1236_v26, %v482_v14  ;;  %v489_v30 = vmul.f32 %v1236_v26, %v483_v15 }
 0x14c   : > { %v490_v44 = vadd.f32 %v488_v28, %v471_v36  ;;  %v491_v45 = vadd.f32 %v489_v30, %v472_v24 }
 0x14e   : > { %v524_v42 = vpop.permute.xlu1 %523  ;;  %v509_v55 = vadd.f32 %v507_v49, %v490_v44  ;;  %v510_v40 = vadd.f32 %v508_v50, %v491_v45  ;;  %v562_v61 = vpop.permute.xlu2 %561 }
 0x14f   : > { %v552_v26 = vpop.permute.xlu0 %551  ;;  %v526_v56 = vmul.f32 %v524_v42, %v520_v51  ;;  %v527_v57 = vmul.f32 %v524_v42, %v521_v52 }
 0x150   : > { %v554_v54 = vsel %vm553_vm9, %v550_v37, %v552_v26  ;;  %v555_v39 = vsel %vm553_vm9, %v552_v26, %v550_v37 }
 0x151   : > { %v558_v58 = vmul.f32 %v885_v41, %v554_v54  ;;  %v559_v29 = vmul.f32 %v886_v47, %v555_v39  ;;  %v528_v63 = vadd.f32 %v526_v56, %v509_v55  ;;  %v529_v0 = vadd.f32 %v527_v57, %v510_v40 }
 0x153   : > { %v564_v4 = vmul.f32 %v562_v61, %v558_v58  ;;  %v565_v2 = vmul.f32 %v562_v61, %v559_v29 }
 0x157   : > { %v543_v62 = vpop.permute.xlu1 %542  ;;  %v573_v10 = vpop.permute.xlu0 %572 }
 0x158   : > { %v545_v1 = vmul.f32 %v543_v62, %v539_v59  ;;  %v546_v3 = vmul.f32 %v543_v62, %v540_v60 }
 0x15a   : > { %v547_v5 = vadd.f32 %v545_v1, %v528_v63  ;;  %v548_v6 = vadd.f32 %v546_v3, %v529_v0 }
 0x15c   : > { %v566_v7 = vadd.f32 %v564_v4, %v547_v5  ;;  %v567_v8 = vadd.f32 %v565_v2, %v548_v6 }
 0x15e   : > { %594 = vmatpush.msra.mxu2 %v566_v7  ;;  %614 = vmatpush.msra.mxu3 %v567_v8 }
 0x15f   : > { %788 = vmatmul.msk.f32.vlgmr.msra.gmra.mxu2 %vm575_vm10, %v568_v9  ;;  %789 = vmatmul.msk.f32.vlgmr.msra.gmra.mxu3 %vm575_vm10, %v568_v9 }
 0x1e2   : > { %v596_v13 = vpop.f32.mrf.mxu2  ;;  %v616_v14 = vpop.f32.mrf.mxu3 }
 0x1e3   : > { %v597_v15 = vadd.f32 %v596_v13, %v573_v10  ;;  %v617_v16 = vadd.f32 %v616_v14, %v573_v10 }
 0x1e5   : > { %v670_v17 = vadd.f32 %v647_v11, %v597_v15  ;;  %v671_v18 = vadd.f32 %v667_v12, %v617_v16 }
 0x1e7   : > { %v672_v20 = vmax.f32 %v670_v17, 0.0  ;;  %v673_v21 = vmax.f32 %v671_v18, 0.0 }
 0x1e9   : > { %674 = vst [vmem:[%s338_s22] sm:$0xff] %v672_v20 }
 0x1ea   : > { %675 = vst [vmem:[%s338_s22 + $0x8] sm:$0xff] %v673_v21 }
 0x1eb   : > { %974 = shalt.err (!%p971_p11)
}
 0x1ec   : > { %807 = dma.vmem_to_hbm [thread:$0]  (%p1148_p3), %s691_s15, 256, %s693_s18, %s677_s9  }
 0x1ed PF: > { %s704_s24 = sand.u32 1, %s1005_s27   ;;  %p1354_p12 = scmp.ge.s32.totalorder %s1017_s30, 2 }
 0x1ee   : > { %s705_s10 = scalar_lea.sflag [#allocation4], %s704_s24 }
 0x1ef   : > { %p818_p13 = pnand %p1354_p12, %p1117_p6 }
 0x1f1   : > { %p819_p0 = pneg %p818_p13 }
 0x1f3   : > { %1000 = dma.done.wait (%p819_p0), %s705_s10, 256  }
 0x1f4   : > { %1002 = vsyncadd (%p819_p0), %s705_s10, 4294967040  ;;  %s1355_s5 = sld [smem:[#allocation11_spill]]  ;;  %p22_p5 = scmp.ge.s32.totalorder %s1135_s19, 4  }
 0x1f5   : > { %s1356_s27 = smov %s1009_s28  ;;  %s1357_s28 = smov %s1013_s29 }
 0x1f6   : > { %s1359_s30 = smov %s1135_s19  ;;  %24 = sbr.rel (!%p22_p5) target bundleno = 8 (0x8), region = 101 }
 0x1fa   : > { %s1358_s29 = smov %s1355_s5 }
 0x1fb   :  { %711 = vsyncpa [#allocation3], 1 }
 0x1fc   :  { %713 = vsyncpa [#allocation3 + $0x1], 1 }
 0x1fd   :  { %714 = vsyncpa [#allocation6], 1 }
 0x1fe   :  { %715 = vsyncpa [#allocation4], 1 }
 0x1ff   :  { %717 = vsyncpa [#allocation4 + $0x1], 1 }

</bundles_post_ra>
